<compile_context>
chip_gen: v5e
topology: v5e:2x2
jax: 0.10.0
libtpu: 0.0.40
codegen_flags: <defaults>
</compile_context>

<pallas_src>
import math
import jax
import jax.numpy as jnp
from jax.experimental import pallas as pl
from jax.experimental.pallas import tpu as pltpu


# ----------------------------- module construction -----------------------------

def build_layer_dims(n_genes, shrinkage_factor=10, minimum_size=10, final_size=1):
    """Replicates the layer-size construction loop of ConnectedLayers.__init__."""
    dims = []
    n = n_genes
    while minimum_size <= (n_out := (n // shrinkage_factor)):
        dims.append((n, n_out))   # Linear(n, n_out) with bias, followed by ReLU
        n = n_out
    dims.append((n, final_size))  # Linear(n, final_size, bias=False)
    return dims


def init_params(key, dims):
    """Deterministic init mimicking torch.nn.Linear default (uniform +/- 1/sqrt(fan_in)).
    Weights are returned already transposed to [in, out]."""
    params = []
    n_layers = len(dims)
    for li, (n_in, n_out) in enumerate(dims):
        key, kw, kb = jax.random.split(key, 3)
        bound = 1.0 / math.sqrt(n_in)
        w = jax.random.uniform(kw, (n_in, n_out), jnp.float32, -bound, bound)
        if li < n_layers - 1:  # hidden layers have bias; final layer has bias=False
            b = jax.random.uniform(kb, (1, n_out), jnp.float32, -bound, bound)
            params.append((w, b))
        else:
            params.append((w, None))
    return params


# ------------------------------- chip profiling ---------------------------------

def _round_up(x, m):
    return ((x + m - 1) // m) * m


def _ceil_div(a, b):
    return -(-a // b)


def _chip_profile():
    """Per-generation knobs: VMEM budget, TensorCores per chip, MXU N width."""
    kind = ""
    try:
        kind = jax.devices()[0].device_kind.lower()
    except Exception:
        pass
    if "v7" in kind or "7x" in kind:
        prof = dict(name="v7x", vmem_budget=48 << 20, num_cores=2, wide_mxu=True)
    elif "v6" in kind:
        prof = dict(name="v6e", vmem_budget=100 << 20, num_cores=1, wide_mxu=True)
    elif "v5" in kind:
        prof = dict(name="v5e", vmem_budget=100 << 20, num_cores=1, wide_mxu=False)
    else:  # unknown chip: be conservative
        prof = dict(name=kind or "unknown", vmem_budget=48 << 20, num_cores=1,
                    wide_mxu=False)
    try:
        cap = pltpu.get_tpu_info().vmem_capacity_bytes
        prof["vmem_budget"] = min(prof["vmem_budget"], max(32 << 20, (cap * 3) // 4))
    except Exception:
        pass
    return prof


def _align_feature(h, profile):
    """Lane-align a feature (N) dim: 256 on v6e/v7x when the layer is already
    >= 256 wide (full-width MXU passes), otherwise 128 (don't double the bytes
    of narrow layers in the memory-bound regime)."""
    if profile["wide_mxu"] and h >= 256:
        return _round_up(h, 256)
    return _round_up(h, 128)


def _vmem_usage_bytes(tile_b, tile_k, h1p, final_cols, resident_bytes):
    """Estimate of double-buffered VMEM footprint for one grid step."""
    x_buf = 2 * tile_b * tile_k * 2          # bf16 x tile, double-buffered
    w1_buf = 2 * tile_k * h1p * 2            # bf16 W1 tile, double-buffered
    b1_buf = 2 * 8 * h1p * 4                 # f32 bias row (sublane-padded)
    acc = tile_b * h1p * 4                   # f32 accumulator scratch
    out_buf = 2 * tile_b * max(final_cols, 128) * 4
    return x_buf + w1_buf + b1_buf + acc + out_buf + resident_bytes


# ----------------------- one-time parameter preparation -------------------------

def prepare_params(params, *, max_tile_b=1024, max_tile_k=4096, profile=None):
    """Pad/cast every weight ONCE (bf16 MXU operands, f32 biases) and pick the
    per-generation K tile.  The returned dict is reused by every forward call."""
    profile = dict(profile) if profile else _chip_profile()
    num_hidden = len(params) - 1
    if num_hidden < 1:
        # TODO(synk): n_genes too small to produce any hidden layer (the module
        # degenerates to a single bias-free Linear); not exercised here.
        raise NotImplementedError("ConnectedLayers with zero hidden layers")

    w1, b1 = params[0]
    n_genes, H1 = w1.shape
    H1p = _align_feature(H1, profile)

    # Small resident layers (2..num_hidden) + final head, padded + cast once.
    resident, resident_specs = [], []
    resident_bytes = 0
    prev, prev_pad = H1, H1p
    for li in range(1, num_hidden):
        w, b = params[li]
        Ho = w.shape[1]
        Hop = _align_feature(Ho, profile)
        w_p = jnp.pad(w, ((0, prev_pad - prev), (0, Hop - Ho))).astype(jnp.bfloat16)
        b_p = jnp.pad(b, ((0, 0), (0, Hop - Ho)))                     # f32
        resident += [w_p, b_p]
        resident_specs += [(prev_pad, Hop), (1, Hop)]
        resident_bytes += 2 * (prev_pad * Hop * 2 + 8 * Hop * 4)
        prev, prev_pad = Ho, Hop

    w_last = params[-1][0]
    final_size = w_last.shape[1]
    if final_size == 1:
        wl = jnp.pad(w_last.T, ((0, 0), (0, prev_pad - prev)))        # f32 row (1, Hp)
        resident += [wl]
        resident_specs += [(1, prev_pad)]
        resident_bytes += 2 * 8 * prev_pad * 4
    else:
        wl = jnp.pad(w_last, ((0, prev_pad - prev), (0, 0))).astype(jnp.bfloat16)
        resident += [wl]
        resident_specs += [(prev_pad, final_size)]
        resident_bytes += 2 * prev_pad * max(final_size, 128) * 2

    # ---- tile selection: fit the generation's VMEM budget ----
    # Keep TILE_B as large as possible (W1 is re-streamed once per batch tile,
    # so TILE_B is the W1-reuse / roofline knob: need ~240 rows on v5e,
    # ~650 on v6e, ~620/core on v7x to be MXU-bound on layer 1).
    # When over budget shrink TILE_K first (same total HBM bytes), TILE_B last.
    budget = profile["vmem_budget"]
    tile_b_cap = max(16, _round_up(min(max_tile_b, 4096), 16))
    tile_k = min(_round_up(n_genes, 128), max(128, _round_up(max_tile_k, 128)))
    while (_vmem_usage_bytes(tile_b_cap, tile_k, H1p, final_size, resident_bytes)
           > budget and tile_k > 512):
        tile_k = max(512, _round_up(tile_k // 2, 128))
    while (_vmem_usage_bytes(tile_b_cap, tile_k, H1p, final_size, resident_bytes)
           > budget and tile_b_cap > 64):
        tile_b_cap = max(64, _round_up(tile_b_cap // 2, 16))

    k_pad = _round_up(n_genes, tile_k)
    w1_p = jnp.pad(w1, ((0, k_pad - n_genes), (0, H1p - H1))).astype(jnp.bfloat16)
    b1_p = jnp.pad(b1, ((0, 0), (0, H1p - H1)))                       # f32

    return dict(
        profile=profile, n_genes=n_genes, num_hidden=num_hidden,
        final_size=final_size, h1p=H1p,
        tile_k=tile_k, k_pad=k_pad, tile_b_cap=tile_b_cap,
        w1=w1_p, b1=b1_p, resident=resident, resident_specs=resident_specs,
        resident_bytes=resident_bytes,
    )


# ----------------------------------- kernel ------------------------------------

def make_mlp_kernel(num_hidden, final_size):
    """Kernel arg order:
       x_ref, w1_ref, b1_ref, (w_i, b_i for hidden layers 2..), w_last_ref,
       o_ref, acc_ref(scratch)."""
    def kernel(*refs):
        x_ref = refs[0]
        o_ref = refs[-2]
        acc_ref = refs[-1]
        param_refs = refs[1:-2]

        k = pl.program_id(1)
        nk = pl.num_programs(1)

        # K-tiled first Linear: bf16 operands on the MXU, f32 accumulation.
        partial = jnp.dot(x_ref[...], param_refs[0][...],
                          preferred_element_type=jnp.float32)

        @pl.when(k == 0)
        def _first():                 # direct store: no zero-fill, no RMW
            acc_ref[...] = partial

        @pl.when(k > 0)
        def _accum():
            acc_ref[...] += partial

        @pl.when(k == nk - 1)
        def _finish():
            b1 = param_refs[1][...]                       # f32 (1, H1p)
            h = jnp.maximum(acc_ref[...] + b1, 0.0)       # bias + ReLU in f32
            idx = 2
            for _ in range(num_hidden - 1):               # small resident layers
                w = param_refs[idx][...]                  # bf16
                b = param_refs[idx + 1][...]              # f32
                idx += 2
                h = jnp.dot(h.astype(jnp.bfloat16), w,
                            preferred_element_type=jnp.float32) + b
                h = jnp.maximum(h, 0.0)
            w_last = param_refs[idx][...]
            if final_size == 1:
                # N=1 "matmul" as a VPU broadcast-multiply + lane reduce.
                out = jnp.sum(h * w_last, axis=-1, keepdims=True)
            else:
                out = jnp.dot(h.astype(jnp.bfloat16), w_last,
                              preferred_element_type=jnp.float32)
            o_ref[...] = out.astype(o_ref.dtype)
    return kernel


# ---------------------------------- wrapper -------------------------------------

def connected_layers_forward(x, prepared):
    """Full ConnectedLayers forward.  Weights must come from prepare_params();
    only x is padded/cast per call."""
    B, n_genes = x.shape
    assert n_genes == prepared["n_genes"], (n_genes, prepared["n_genes"])

    profile = prepared["profile"]
    tile_k = prepared["tile_k"]
    k_pad = prepared["k_pad"]
    h1p = prepared["h1p"]
    final_size = prepared["final_size"]
    num_hidden = prepared["num_hidden"]

    # TILE_B: multiple of 16 (bf16 sublane packing); on multi-core chips (v7x)
    # cap it so the "parallel" batch axis has >= 2 tiles when B permits.
    b16 = _round_up(B, 16)
    tile_b = min(b16, prepared["tile_b_cap"])
    if profile["num_cores"] >= 2 and b16 >= 32:
        tile_b = min(tile_b, _round_up(_ceil_div(b16, 2), 16))
    b_pad = _round_up(B, tile_b)

    # Per-call work on x only (zero padding is semantics-preserving).
    x_p = x.astype(jnp.bfloat16) if x.dtype != jnp.bfloat16 else x
    if (b_pad, k_pad) != (B, n_genes):
        x_p = jnp.pad(x_p, ((0, b_pad - B), (0, k_pad - n_genes)))

    flat_inputs = [x_p, prepared["w1"], prepared["b1"]] + list(prepared["resident"])
    in_specs = [pl.BlockSpec((tile_b, tile_k), lambda i, k: (i, k)),
                pl.BlockSpec((tile_k, h1p), lambda i, k: (k, 0)),
                pl.BlockSpec((1, h1p), lambda i, k: (0, 0))]
    for shp in prepared["resident_specs"]:
        in_specs.append(pl.BlockSpec(shp, lambda i, k: (0, 0)))

    grid = (b_pad // tile_b, k_pad // tile_k)

    usage = _vmem_usage_bytes(tile_b, tile_k, h1p, final_size,
                              prepared["resident_bytes"])
    vmem_limit = int(max(16 << 20, min(profile["vmem_budget"], usage + (8 << 20))))

    kernel = make_mlp_kernel(num_hidden, final_size)
    out = pl.pallas_call(
        kernel,
        out_shape=jax.ShapeDtypeStruct((b_pad, final_size), jnp.float32),
        grid_spec=pltpu.PrefetchScalarGridSpec(
            num_scalar_prefetch=0,
            grid=grid,
            in_specs=in_specs,
            out_specs=pl.BlockSpec((tile_b, final_size), lambda i, k: (i, 0)),
            scratch_shapes=[pltpu.VMEM((tile_b, h1p), jnp.float32)],
        ),
        compiler_params=pltpu.CompilerParams(
            dimension_semantics=("parallel", "arbitrary"),
            vmem_limit_bytes=vmem_limit,
        ),
    )(*flat_inputs)
    return out[:B]


# --------------------------------- references -----------------------------------

def connected_layers_reference(x, params):
    """Plain-JAX f32 reference (matches the PyTorch module)."""
    h = x
    for w, b in params[:-1]:
        h = jnp.maximum(h @ w + b, 0.0)
    w_last, _ = params[-1]
    return h @ w_last


def connected_layers_reference_bf16(x, params):
    """Plain-JAX reference mimicking the kernel's mixed precision
    (bf16 MXU operands, f32 accumulation / bias / ReLU, f32 final reduce)."""
    h = x.astype(jnp.bfloat16)
    first = True
    for w, b in params[:-1]:
        lhs = h if first else h.astype(jnp.bfloat16)
        h = jnp.dot(lhs, w.astype(jnp.bfloat16),
                    preferred_element_type=jnp.float32) + b
        h = jnp.maximum(h, 0.0)
        first = False
    w_last, _ = params[-1]
    return h @ w_last


# ------------------------------------ demo --------------------------------------

if __name__ == "__main__":
    # Small, consistent shapes: n_genes=320 -> layers Linear(320,32)+ReLU,
    # Linear(32,1,bias=False)
    B = 8
    N_GENES = 320

    key = jax.random.PRNGKey(0)
    key, kx = jax.random.split(key)
    x = jax.random.normal(kx, (B, N_GENES), jnp.float32)

    dims = build_layer_dims(N_GENES, shrinkage_factor=10, minimum_size=10, final_size=1)
    params = init_params(key, dims)

    prepared = prepare_params(params)           # one-time weight pad/cast + tiling
    out = connected_layers_forward(x, prepared)
    out = jax.block_until_ready(out)

    ref_mixed = connected_layers_reference_bf16(x, params)
    ref_f32 = connected_layers_reference(x, params)

    assert out.shape == (B, 1), out.shape
    assert jnp.allclose(out, ref_mixed, atol=2e-3, rtol=2e-3), (out, ref_mixed)
    assert jnp.allclose(out, ref_f32, atol=5e-2, rtol=5e-2), (out, ref_f32)

    print("KERNEL_OK")
</pallas_src>

<mosaic_0001>
module attributes {stable_mosaic.version = 11 : i64} {
  func.func @kernel(%arg0: i32, %arg1: i32, %arg2: memref<16x384xbf16, #tpu.memory_space<vmem>>, %arg3: memref<384x128xbf16, #tpu.memory_space<vmem>>, %arg4: memref<1x128xf32, #tpu.memory_space<vmem>>, %arg5: memref<1x128xf32, #tpu.memory_space<vmem>>, %arg6: memref<16x1xf32, #tpu.memory_space<vmem>>, %arg7: memref<16x128xf32, #tpu.memory_space<vmem>>) attributes {dimension_semantics = [#tpu.dimension_semantics<parallel>, #tpu.dimension_semantics<arbitrary>], iteration_bounds = array<i64: 1, 1>, scalar_prefetch = 0 : i64, scratch_operands = 1 : i64, tpu.core_type = #tpu.core_type<tc>, window_params = [{transform_indices = @transform_0, window_bounds = array<i64: 16, 384>}, {transform_indices = @transform_1, window_bounds = array<i64: 384, 128>}, {pipeline_mode = #tpu.pipeline_mode<synchronous>, transform_indices = @transform_2, window_bounds = array<i64: 1, 128>}, {pipeline_mode = #tpu.pipeline_mode<synchronous>, transform_indices = @transform_3, window_bounds = array<i64: 1, 128>}, {transform_indices = @transform_4, window_bounds = array<i64: 16, 1>}]} {
    %c0 = arith.constant 0 : index
    %c0_0 = arith.constant 0 : index
    %0 = vector.load %arg2[%c0, %c0_0] : memref<16x384xbf16, #tpu.memory_space<vmem>>, vector<16x384xbf16>
    %c0_1 = arith.constant 0 : index
    %c0_2 = arith.constant 0 : index
    %1 = vector.load %arg3[%c0_1, %c0_2] : memref<384x128xbf16, #tpu.memory_space<vmem>>, vector<384x128xbf16>
    %cst = arith.constant dense<0.000000e+00> : vector<16x128xf32>
    %2 = tpu.matmul %0, %1, %cst {dimension_numbers = #tpu.dot_dimension_numbers<[1], [0], [0], [1], [0, 0, 1, 1], [], []>} : vector<16x384xbf16>, vector<384x128xbf16>, vector<16x128xf32> -> vector<16x128xf32>
    %c0_i32 = arith.constant 0 : i32
    %3 = arith.cmpi eq, %arg1, %c0_i32 : i32
    %4 = arith.extui %3 : i1 to i32
    %c0_i32_3 = arith.constant 0 : i32
    %5 = arith.cmpi ne, %4, %c0_i32_3 : i32
    scf.if %5 {
      %c0_8 = arith.constant 0 : index
      %c0_9 = arith.constant 0 : index
      %12 = vector.load %arg7[%c0_8, %c0_9] : memref<16x128xf32, #tpu.memory_space<vmem>>, vector<16x128xf32>
      tpu.vector_store %arg7[%c0_8, %c0_9], %2 {strides = array<i32>} : memref<16x128xf32, #tpu.memory_space<vmem>>, vector<16x128xf32>,
    } else {
    }
    %c0_i32_4 = arith.constant 0 : i32
    %6 = arith.cmpi sgt, %arg1, %c0_i32_4 : i32
    %7 = arith.extui %6 : i1 to i32
    %c0_i32_5 = arith.constant 0 : i32
    %8 = arith.cmpi ne, %7, %c0_i32_5 : i32
    scf.if %8 {
      %c0_8 = arith.constant 0 : index
      %c0_9 = arith.constant 0 : index
      %12 = vector.load %arg7[%c0_8, %c0_9] : memref<16x128xf32, #tpu.memory_space<vmem>>, vector<16x128xf32>
      %13 = arith.addf %12, %2 : vector<16x128xf32>
      %c0_10 = arith.constant 0 : index
      %c0_11 = arith.constant 0 : index
      %14 = vector.load %arg7[%c0_10, %c0_11] : memref<16x128xf32, #tpu.memory_space<vmem>>, vector<16x128xf32>
      tpu.vector_store %arg7[%c0_10, %c0_11], %13 {strides = array<i32>} : memref<16x128xf32, #tpu.memory_space<vmem>>, vector<16x128xf32>,
    } else {
    }
    %c0_i32_6 = arith.constant 0 : i32
    %9 = arith.cmpi eq, %arg1, %c0_i32_6 : i32
    %10 = arith.extui %9 : i1 to i32
    %c0_i32_7 = arith.constant 0 : i32
    %11 = arith.cmpi ne, %10, %c0_i32_7 : i32
    scf.if %11 {
      %c0_8 = arith.constant 0 : index
      %c0_9 = arith.constant 0 : index
      %12 = vector.load %arg4[%c0_8, %c0_9] : memref<1x128xf32, #tpu.memory_space<vmem>>, vector<1x128xf32>
      %c0_10 = arith.constant 0 : index
      %c0_11 = arith.constant 0 : index
      %13 = vector.load %arg7[%c0_10, %c0_11] : memref<16x128xf32, #tpu.memory_space<vmem>>, vector<16x128xf32>
      %14 = vector.broadcast %12 : vector<1x128xf32> to vector<16x128xf32>
      %15 = arith.addf %13, %14 : vector<16x128xf32>
      %cst_12 = arith.constant 0.000000e+00 : f32
      %16 = vector.broadcast %cst_12 : f32 to vector<16x128xf32>
      %17 = arith.maximumf %15, %16 : vector<16x128xf32>
      %c0_13 = arith.constant 0 : index
      %c0_14 = arith.constant 0 : index
      %18 = vector.load %arg5[%c0_13, %c0_14] : memref<1x128xf32, #tpu.memory_space<vmem>>, vector<1x128xf32>
      %19 = vector.broadcast %18 : vector<1x128xf32> to vector<16x128xf32>
      %20 = arith.mulf %17, %19 : vector<16x128xf32>
      %cst_15 = arith.constant dense<0.000000e+00> : vector<16xf32>
      %21 = vector.multi_reduction <add>, %20, %cst_15 [1] : vector<16x128xf32> to vector<16xf32>
      %22 = vector.shape_cast %21 : vector<16xf32> to vector<16x1xf32>
      %c0_16 = arith.constant 0 : index
      %c0_17 = arith.constant 0 : index
      %23 = vector.load %arg6[%c0_16, %c0_17] : memref<16x1xf32, #tpu.memory_space<vmem>>, vector<16x1xf32>
      tpu.vector_store %arg6[%c0_16, %c0_17], %22 {strides = array<i32>} : memref<16x1xf32, #tpu.memory_space<vmem>>, vector<16x1xf32>,
    } else {
    }
    return
  }
  func.func @transform_0(%arg0: i32, %arg1: i32) -> (i32, i32) {
    %c0_i32 = arith.constant 0 : i32
    return %arg0, %arg1 : i32, i32
  }
  func.func @transform_1(%arg0: i32, %arg1: i32) -> (i32, i32) {
    %c0_i32 = arith.constant 0 : i32
    %c0_i32_0 = arith.constant 0 : i32
    return %arg1, %c0_i32 : i32, i32
  }
  func.func @transform_2(%arg0: i32, %arg1: i32) -> (i32, i32) {
    %c0_i32 = arith.constant 0 : i32
    %c0_i32_0 = arith.constant 0 : i32
    %c0_i32_1 = arith.constant 0 : i32
    return %c0_i32, %c0_i32_0 : i32, i32
  }
  func.func @transform_3(%arg0: i32, %arg1: i32) -> (i32, i32) {
    %c0_i32 = arith.constant 0 : i32
    %c0_i32_0 = arith.constant 0 : i32
    %c0_i32_1 = arith.constant 0 : i32
    return %c0_i32, %c0_i32_0 : i32, i32
  }
  func.func @transform_4(%arg0: i32, %arg1: i32) -> (i32, i32) {
    %c0_i32 = arith.constant 0 : i32
    %c0_i32_0 = arith.constant 0 : i32
    return %arg0, %c0_i32 : i32, i32
  }
}

</mosaic_0001>

<bundles_post_ra>
// kernel: tpu_custom_call.1
= control target key start
LH: loop header
LB: loop body
LE: loop exit
PB: predicated region body
PF: predicated region fallthrough
CT: control target
= control target key end

     0   :  { %9 = vsyncpa [#allocation4], 0  ;;  %s595_s0 = inlined_call_operand.hbm [shape: bf16[16,384], index: 0, kind: input, shape index: {}]   ;;  %s596_s1 = inlined_call_operand.hbm [shape: bf16[384,128], index: 1, kind: input, shape index: {}]   ;;  %s597_s2 = inlined_call_operand.vmem [shape: f32[1,128], index: 2, kind: input, shape index: {}]   ;;  %s598_s3 = inlined_call_operand.vmem [shape: f32[1,128], index: 3, kind: input, shape index: {}]   ;;  %s599_s4 = inlined_call_operand.vmem [shape: f32[16,1], index: 4, kind: output, shape index: {}]  }
   0x1   :  { %s15_s17 = sshll.u32 %s595_s0, 4  ;;  %s16_s17 = int_to_ptr.hbm [resolvable:$true] %s15_s17 }
   0x2   :  { %10 = vsyncpa [#allocation6], 0  ;;  %s546_s18 = smov [#allocation3]   ;;  %s28_s22 = sshll.u32 %s596_s1, 4  ;;  %s29_s22 = int_to_ptr.hbm [resolvable:$true] %s28_s22 }
   0x3   :  { %s17_s19 = sshll.u32 %s546_s18, 4  ;;  %s547_s23 = smov 192   ;;  %s18_s19 = int_to_ptr.vmem [resolvable:$true] %s17_s19 }
   0x4   :  { %s548_s24 = smov 12   ;;  %s549_s25 = smov [#allocation5]  }
   0x5   :  { %23 = dma.hbm_to_vmem [thread:$0]  %s16_s17, 384, %s18_s19, [#allocation4], %s547_s23, %s547_s23, %s548_s24  }
   0x6   :  { %s30_s26 = sshll.u32 %s549_s25, 4  ;;  %s550_s27 = smov 64   ;;  %s31_s26 = int_to_ptr.vmem [resolvable:$true] %s30_s26 }
   0x7   :  { %s551_s28 = smov 4  }
   0x8   :  { %36 = dma.hbm_to_vmem [thread:$0]  %s29_s22, 3072, %s31_s26, [#allocation6], %s550_s27, %s550_s27, %s551_s28  }
   0x9   :  { %542 = dma.done.wait [#allocation4], 384  }
   0xa   :  { %543 = vsyncadd [#allocation4], 4294966912 }
   0xb   :  { %544 = dma.done.wait [#allocation6], 3072  }
   0xc   :  { %545 = vsyncadd [#allocation6], 4294964224  ;;  %v469_v0 = vld [vmem:[#allocation5 + $0x38] sm:$0xff]  ;;  %v468_v3 = vld [vmem:[#allocation5 + $0x30] sm:$0xff]  ;;  %vm342_vm0 = vcmask 7168  }
   0xd   :  { %v477_v1 = vld [vmem:[#allocation5 + $0x78] sm:$0xff]  ;;  %261 = vmatpush.bf16.msra.mxu0 %v469_v0  ;;  %v476_v4 = vld [vmem:[#allocation5 + $0x70] sm:$0xff]  ;;  %v467_v6 = vld [vmem:[#allocation5 + $0x28] sm:$0xff] }
   0xe   :  { %v485_v2 = vld [vmem:[#allocation5 + $0xb8] sm:$0xff]  ;;  %275 = vmatpush.bf16.msra.mxu1 %v477_v1  ;;  %v484_v5 = vld [vmem:[#allocation5 + $0xb0] sm:$0xff]  ;;  %v475_v7 = vld [vmem:[#allocation5 + $0x68] sm:$0xff] }
   0xf   :  { %289 = vmatpush.bf16.msra.mxu2 %v485_v2  ;;  %v483_v8 = vld [vmem:[#allocation5 + $0xa8] sm:$0xff]  ;;  %v466_v9 = vld [vmem:[#allocation5 + $0x20] sm:$0xff]  ;;  %v465_v12 = vld [vmem:[#allocation5 + $0x18] sm:$0xff] }
  0x10   :  { %v474_v10 = vld [vmem:[#allocation5 + $0x60] sm:$0xff]  ;;  %v473_v13 = vld [vmem:[#allocation5 + $0x58] sm:$0xff]  ;;  %v464_v15 = vld [vmem:[#allocation5 + $0x10] sm:$0xff] }
  0x11   :  { %262 = vmatpush.bf16.msra.mxu0 %v468_v3  ;;  %v482_v11 = vld [vmem:[#allocation5 + $0xa0] sm:$0xff]  ;;  %v481_v14 = vld [vmem:[#allocation5 + $0x98] sm:$0xff]  ;;  %v472_v16 = vld [vmem:[#allocation5 + $0x50] sm:$0xff] }
  0x12   :  { %276 = vmatpush.bf16.msra.mxu1 %v476_v4  ;;  %v480_v17 = vld [vmem:[#allocation5 + $0x90] sm:$0xff]  ;;  %v463_v18 = vld [vmem:[#allocation5 + $0x8] sm:$0xff]  ;;  %v462_v21 = vld [vmem:[#allocation5] sm:$0xff] }
  0x13   :  { %290 = vmatpush.bf16.msra.mxu2 %v484_v5  ;;  %v471_v19 = vld [vmem:[#allocation5 + $0x48] sm:$0xff]  ;;  %v470_v22 = vld [vmem:[#allocation5 + $0x40] sm:$0xff]  ;;  %v460_v24 = vld [vmem:[#allocation3 + $0x8] sm:$0xf0] }
  0x14   :  { %v479_v20 = vld [vmem:[#allocation5 + $0x88] sm:$0xff]  ;;  %v355_v26 = vld [vmem:[#allocation3 + $0xc] sm:$0xf0]  ;;  %v478_v27 = vld [vmem:[#allocation5 + $0x80] sm:$0xff] }
  0x15   :  { %263 = vmatpush.bf16.msra.mxu0 %v467_v6  ;;  %v353_v23 = vld [vmem:[#allocation3] sm:$0xf]  ;;  %v459_v25 = vld [vmem:[#allocation3 + $0x4] sm:$0xf]  ;;  %v361_v28 = vld [vmem:[#allocation3 + $0x8] sm:$0xf] }
  0x16   :  { %277 = vmatpush.bf16.msra.mxu1 %v475_v7  ;;  %v461_v29 = vld [vmem:[#allocation3 + $0x10] sm:$0xf0]  ;;  %v354_v30 = vor.u32 %v460_v24, %v353_v23  ;;  %v358_v31 = vor.u32 %v459_v25, %v355_v26  ;;  %v492_v36 = vld [vmem:[%s597_s2] ss:$0 sm:$0xff] }
  0x17   :  { %291 = vmatpush.bf16.msra.mxu2 %v483_v8  ;;  %v362_v32 = vor.u32 %v461_v29, %v361_v28  ;;  %v493_v40 = vld [vmem:[%s598_s3] ss:$0 sm:$0xff] }
  0x19   :  { %264 = vmatpush.bf16.msra.mxu0 %v466_v9 }
  0x1a   :  { %278 = vmatpush.bf16.msra.mxu1 %v474_v10 }
  0x1b   :  { %292 = vmatpush.bf16.msra.mxu2 %v482_v11 }
  0x1d   :  { %265 = vmatpush.bf16.msra.mxu0 %v465_v12 }
  0x1e   :  { %279 = vmatpush.bf16.msra.mxu1 %v473_v13 }
  0x1f   :  { %293 = vmatpush.bf16.msra.mxu2 %v481_v14 }
  0x21   :  { %266 = vmatpush.bf16.msra.mxu0 %v464_v15 }
  0x22   :  { %280 = vmatpush.bf16.msra.mxu1 %v472_v16 }
  0x23   :  { %294 = vmatpush.bf16.msra.mxu2 %v480_v17 }
  0x25   :  { %267 = vmatpush.bf16.msra.mxu0 %v463_v18 }
  0x26   :  { %281 = vmatpush.bf16.msra.mxu1 %v471_v19 }
  0x27   :  { %295 = vmatpush.bf16.msra.mxu2 %v479_v20 }
  0x29   :  { %268 = vmatpush.bf16.msra.mxu0 %v462_v21 }
  0x2a   :  { %282 = vmatpush.bf16.msra.mxu1 %v470_v22 }
  0x2b   :  { %296 = vmatpush.bf16.msra.mxu2 %v478_v27 }
  0x2c   :  { %269 = vmatmul.bf16.vlgmr.msra.gmra.mxu0 %v354_v30 }
  0x2d   :  { %283 = vmatmul.bf16.vlgmr.msra.gmra.mxu1 %v358_v31 }
  0x2e   :  { %297 = vmatmul.bf16.vlgmr.msra.gmra.mxu2 %v362_v32 }
  0xa9   :  { %v270_v33 = vpop.f32.mrf.mxu0 }
  0xaa   :  { %v284_v34 = vpop.f32.mrf.mxu1 }
  0xab   :  { %v285_v35 = vadd.f32 %v284_v34, %v270_v33 }
  0xb1   :  { %v298_v37 = vpop.f32.mrf.mxu2  ;;  %v272_v41 = vpop.f32.mrf.mxu0 }
  0xb2   :  { %v299_v38 = vadd.f32 %v298_v37, %v285_v35  ;;  %v286_v42 = vpop.f32.mrf.mxu1 }
  0xb3   :  { %v287_v44 = vadd.f32 %v286_v42, %v272_v41 }
  0xb4   :  { %v328_v39 = vadd.f32 %v492_v36, %v299_v38 }
  0xb6   :  { %v330_v43 = vmax.f32 %v328_v39, 0.0 }
  0xb8   :  { %v336_v45 = vmul.f32 %v493_v40, %v330_v43 }
  0xb9   :  { %v300_v46 = vpop.f32.mrf.mxu2 }
  0xba   :  { %v301_v47 = vadd.f32 %v300_v46, %v287_v44  ;;  %338 = vadd.xlane.f32.xlu0 %v336_v45 }
  0xbc   :  { %v329_v48 = vadd.f32 %v492_v36, %v301_v47 }
  0xbe   :  { %v331_v49 = vmax.f32 %v329_v48, 0.0 }
  0xc0   :  { %v337_v50 = vmul.f32 %v493_v40, %v331_v49 }
  0xc2   :  { %340 = vadd.xlane.f32.xlu0 %v337_v50 }
 0x12d   :  { %v339_v51 = vpop.xlane.xlu0 %338 }
 0x12e   :  { %343 = vst.msk [vmem:[%s599_s4] sm:$0xff] %vm342_vm0, %v339_v51 }
 0x135   :  { %v341_v52 = vpop.xlane.xlu0 %340 }
 0x136   :  { %344 = vst.msk [vmem:[%s599_s4 + $0x8] sm:$0xff] %vm342_vm0, %v341_v52 }
 0x137   :  { %349 = vsyncpa [#allocation4], 1 }
 0x138   :  { %350 = vsyncpa [#allocation6], 1 }

</bundles_post_ra>
